<compile_context>
chip_gen: v6e
topology: v6e:2x2x1
jax: 0.10.0
libtpu: 0.0.40
codegen_flags: <defaults>
</compile_context>

<pallas_src>
import functools

import jax
import jax.numpy as jnp
from jax.experimental import pallas as pl
from jax.experimental.pallas import tpu as pltpu

EPS = 1e-5  # nn.LayerNorm default


def _round_up(x, m):
    return (x + m - 1) // m * m


# ---------------------------------------------------------------------------
# Kernels
# ---------------------------------------------------------------------------
def _prenorm_kernel(x_ref, params_ref, w_ref, bias_ref, o_ref, *, inv_d):
    """Fused LayerNorm + Linear; W fully resident (single N block)."""
    x = x_ref[...].astype(jnp.float32)
    # Single-pass statistics in f32 (no padded channels -> no masking needed).
    mean = jnp.sum(x, axis=-1, keepdims=True) * inv_d
    ex2 = jnp.sum(x * x, axis=-1, keepdims=True) * inv_d
    var = jnp.maximum(ex2 - mean * mean, 0.0)
    xn = (x - mean) * jax.lax.rsqrt(var + EPS)

    p = params_ref[...].astype(jnp.float32)        # (2, D): [gamma; beta]
    y = xn * p[0:1, :] + p[1:2, :]

    # fn: Linear(D, D). bf16 operands, f32 accumulation on the MXU.
    out = jnp.dot(y.astype(jnp.bfloat16), w_ref[...],
                  preferred_element_type=jnp.float32)
    out = out + bias_ref[...].astype(jnp.float32)
    o_ref[...] = out.astype(o_ref.dtype)


def _prenorm_kernel_ntiled(x_ref, params_ref, w_ref, bias_ref, o_ref, y_ref,
                           *, inv_d):
    """Large-D variant: W tiled over output columns (grid axis 1).

    The normalized activations are computed once per row tile (j == 0) and
    cached in VMEM scratch, then reused for every W column tile.
    """
    @pl.when(pl.program_id(1) == 0)
    def _():
        x = x_ref[...].astype(jnp.float32)
        mean = jnp.sum(x, axis=-1, keepdims=True) * inv_d
        ex2 = jnp.sum(x * x, axis=-1, keepdims=True) * inv_d
        var = jnp.maximum(ex2 - mean * mean, 0.0)
        xn = (x - mean) * jax.lax.rsqrt(var + EPS)
        p = params_ref[...].astype(jnp.float32)
        y_ref[...] = (xn * p[0:1, :] + p[1:2, :]).astype(jnp.bfloat16)

    out = jnp.dot(y_ref[...], w_ref[...], preferred_element_type=jnp.float32)
    out = out + bias_ref[...].astype(jnp.float32)
    o_ref[...] = out.astype(o_ref.dtype)


# ---------------------------------------------------------------------------
# Wrapper
# ---------------------------------------------------------------------------
def prepare_params(gamma, beta, w, bias):
    """One-time parameter prep (hoisted out of the per-call path)."""
    params = jnp.stack([gamma, beta]).astype(jnp.float32)   # (2, D) resident
    bias2 = bias.reshape(1, -1).astype(jnp.float32)         # (1, D)
    w_bf16 = w.astype(jnp.bfloat16)                         # (D, D) resident
    return params, bias2, w_bf16


def _vmem_budget_bytes():
    # Generation-aware VMEM budget: ~3/4 of physical per-core VMEM
    # (≈48 MiB on v7x, ≈96 MiB on v5e/v6e). Fallback assumes the smallest.
    try:
        cap = int(pltpu.get_tpu_info().vmem_capacity_bytes)
    except Exception:
        cap = 64 << 20
    return (cap * 3) // 4


def prenorm_forward(x, params, bias, w_bf16, *, tm=1024):
    """x: (B, N, D); params: (2, D) [gamma; beta]; bias: (1, D); w: (D, D)."""
    B, N, D = x.shape
    M = B * N
    assert params.shape == (2, D) and bias.shape == (1, D)
    assert w_bf16.shape == (D, D)

    budget = _vmem_budget_bytes()
    xbytes = x.dtype.itemsize

    # --- W column tiling: only when a double-buffered resident bf16 W would
    # not fit the per-generation VMEM budget (matters for very large D / v7x).
    w_cap = budget // 3
    TN = D
    if D % 128 == 0 and 2 * D * D * 2 > w_cap:
        TN = 128
        t = 128
        while t <= D:
            if D % t == 0 and 2 * D * t * 2 <= w_cap:
                TN = t
            t += 128
    ntiled = TN != D
    num_n = D // TN

    # --- Row tiling: largest TM (multiple of 8, dividing M8) that fits VMEM,
    # capped at M8/2 so both v7x TensorCores get work on small shapes.
    M8 = _round_up(M, 8)

    def fits(t_m):
        est = (2 * t_m * D * xbytes              # double-buffered x tile
               + 2 * t_m * TN * xbytes           # double-buffered out tile
               + 2 * D * TN * 2                  # bf16 W block, double-buffered
               + (t_m * D * 2 if ntiled else 0)  # y scratch
               + t_m * D * 4                     # f32 intermediates headroom
               + 4 * D * 4 + (1 << 20))          # params/bias + slack
        return est <= budget

    cap = min(_round_up(tm, 8), M8)
    if M8 >= 16:
        cap = min(cap, max(8, (M8 // 2) // 8 * 8))   # >= 2 grid rows (v7x)
    TM = 8
    t = 8
    while t <= cap:
        if M8 % t == 0 and fits(t):
            TM = t
        t += 8
    num_m = M8 // TM
    row_pad = M8 - M

    x2 = x.reshape(M, D)
    if row_pad:
        # Rare path (token count not a multiple of 8): pad rows only.
        x2 = jnp.pad(x2, ((0, row_pad), (0, 0)))

    if ntiled:
        kernel = functools.partial(_prenorm_kernel_ntiled, inv_d=1.0 / D)
        grid = (num_m, num_n)
        in_specs = [
            pl.BlockSpec((TM, D), lambda i, j: (i, 0)),   # x rows (resident over j)
            pl.BlockSpec((2, D), lambda i, j: (0, 0)),    # gamma/beta
            pl.BlockSpec((D, TN), lambda i, j: (0, j)),   # W column tile
            pl.BlockSpec((1, TN), lambda i, j: (0, j)),   # bias column tile
        ]
        out_specs = pl.BlockSpec((TM, TN), lambda i, j: (i, j))
        scratch_shapes = [pltpu.VMEM((TM, D), jnp.bfloat16)]
        dim_sem = ("parallel", "arbitrary")
    else:
        kernel = functools.partial(_prenorm_kernel, inv_d=1.0 / D)
        grid = (num_m,)
        in_specs = [
            pl.BlockSpec((TM, D), lambda i: (i, 0)),      # x rows
            pl.BlockSpec((2, D), lambda i: (0, 0)),       # gamma/beta (resident)
            pl.BlockSpec((D, D), lambda i: (0, 0)),       # W (resident, bf16)
            pl.BlockSpec((1, D), lambda i: (0, 0)),       # bias (resident)
        ]
        out_specs = pl.BlockSpec((TM, D), lambda i: (i, 0))
        scratch_shapes = []
        dim_sem = ("parallel",)

    out = pl.pallas_call(
        kernel,
        out_shape=jax.ShapeDtypeStruct((M8, D), x.dtype),
        grid_spec=pltpu.PrefetchScalarGridSpec(
            num_scalar_prefetch=0,
            grid=grid,
            in_specs=in_specs,
            out_specs=out_specs,
            scratch_shapes=scratch_shapes,
        ),
        compiler_params=pltpu.CompilerParams(
            dimension_semantics=dim_sem,
            vmem_limit_bytes=budget,
        ),
    )(x2, params, w_bf16, bias)

    if row_pad:
        out = out[:M]
    return out.reshape(B, N, D)


def prenorm_reference(x, gamma, beta, w, bias):
    # Same math as the kernel: f32 LayerNorm, bf16 matmul, f32 accumulation.
    xf = x.astype(jnp.float32)
    mean = jnp.mean(xf, axis=-1, keepdims=True)
    var = jnp.mean((xf - mean) ** 2, axis=-1, keepdims=True)
    y = (xf - mean) * jax.lax.rsqrt(var + EPS) * gamma + beta
    out = jnp.einsum(
        "bnd,de->bne",
        y.astype(jnp.bfloat16), w.astype(jnp.bfloat16),
        preferred_element_type=jnp.float32,
    ) + bias
    return out.astype(x.dtype)


if __name__ == "__main__":
    B, N, D = 2, 8, 32  # batch=2, seq=8, hidden=32

    key = jax.random.PRNGKey(0)
    kx, kw, kg, kb, kbi = jax.random.split(key, 5)

    x = jax.random.normal(kx, (B, N, D), dtype=jnp.float32)

    # LayerNorm affine params + fn = Linear(D, D) params (deterministic).
    gamma = 1.0 + 0.1 * jax.random.normal(kg, (D,), dtype=jnp.float32)
    beta = 0.1 * jax.random.normal(kb, (D,), dtype=jnp.float32)
    w = jax.random.normal(kw, (D, D), dtype=jnp.float32) * (1.0 / jnp.sqrt(D))
    bias = 0.1 * jax.random.normal(kbi, (D,), dtype=jnp.float32)

    # Parameter prep done once (hoisted out of the per-call path).
    params, bias2, w_bf16 = prepare_params(gamma, beta, w, bias)

    out = prenorm_forward(x, params, bias2, w_bf16)
    out = jax.block_until_ready(out)

    ref = prenorm_reference(x, gamma, beta, w, bias)
    assert out.shape == (B, N, D)
    assert jnp.allclose(out, ref, atol=2e-2, rtol=2e-2), "mismatch vs reference"

    print("KERNEL_OK")
</pallas_src>

<mosaic_0001>
module attributes {stable_mosaic.version = 11 : i64} {
  func.func @_prenorm_kernel(%arg0: i32, %arg1: memref<8x32xf32, #tpu.memory_space<vmem>>, %arg2: memref<2x32xf32, #tpu.memory_space<vmem>>, %arg3: memref<32x32xbf16, #tpu.memory_space<vmem>>, %arg4: memref<1x32xf32, #tpu.memory_space<vmem>>, %arg5: memref<8x32xf32, #tpu.memory_space<vmem>>) attributes {dimension_semantics = [#tpu.dimension_semantics<parallel>], iteration_bounds = array<i64: 2>, scalar_prefetch = 0 : i64, scratch_operands = 0 : i64, tpu.core_type = #tpu.core_type<tc>, window_params = [{transform_indices = @transform_0, window_bounds = array<i64: 8, 32>}, {pipeline_mode = #tpu.pipeline_mode<synchronous>, transform_indices = @transform_1, window_bounds = array<i64: 2, 32>}, {pipeline_mode = #tpu.pipeline_mode<synchronous>, transform_indices = @transform_2, window_bounds = array<i64: 32, 32>}, {pipeline_mode = #tpu.pipeline_mode<synchronous>, transform_indices = @transform_3, window_bounds = array<i64: 1, 32>}, {transform_indices = @transform_4, window_bounds = array<i64: 8, 32>}]} {
    %c0 = arith.constant 0 : index
    %c0_0 = arith.constant 0 : index
    %0 = vector.load %arg1[%c0, %c0_0] : memref<8x32xf32, #tpu.memory_space<vmem>>, vector<8x32xf32>
    %cst = arith.constant dense<0.000000e+00> : vector<8xf32>
    %1 = vector.multi_reduction <add>, %0, %cst [1] : vector<8x32xf32> to vector<8xf32>
    %2 = vector.shape_cast %1 : vector<8xf32> to vector<8x1xf32>
    %cst_1 = arith.constant 3.125000e-02 : f32
    %3 = vector.broadcast %cst_1 : f32 to vector<8x1xf32>
    %4 = arith.mulf %2, %3 : vector<8x1xf32>
    %5 = arith.mulf %0, %0 : vector<8x32xf32>
    %cst_2 = arith.constant dense<0.000000e+00> : vector<8xf32>
    %6 = vector.multi_reduction <add>, %5, %cst_2 [1] : vector<8x32xf32> to vector<8xf32>
    %7 = vector.shape_cast %6 : vector<8xf32> to vector<8x1xf32>
    %cst_3 = arith.constant 3.125000e-02 : f32
    %8 = vector.broadcast %cst_3 : f32 to vector<8x1xf32>
    %9 = arith.mulf %7, %8 : vector<8x1xf32>
    %10 = arith.mulf %4, %4 : vector<8x1xf32>
    %11 = arith.subf %9, %10 : vector<8x1xf32>
    %cst_4 = arith.constant 0.000000e+00 : f32
    %12 = vector.broadcast %cst_4 : f32 to vector<8x1xf32>
    %13 = arith.maximumf %11, %12 : vector<8x1xf32>
    %14 = vector.broadcast %4 : vector<8x1xf32> to vector<8x32xf32>
    %15 = arith.subf %0, %14 : vector<8x32xf32>
    %cst_5 = arith.constant 9.99999974E-6 : f32
    %16 = vector.broadcast %cst_5 : f32 to vector<8x1xf32>
    %17 = arith.addf %13, %16 : vector<8x1xf32>
    %18 = math.rsqrt %17 : vector<8x1xf32>
    %19 = vector.broadcast %18 : vector<8x1xf32> to vector<8x32xf32>
    %20 = arith.mulf %15, %19 : vector<8x32xf32>
    %c0_6 = arith.constant 0 : index
    %c0_7 = arith.constant 0 : index
    %21 = vector.load %arg2[%c0_6, %c0_7] : memref<2x32xf32, #tpu.memory_space<vmem>>, vector<2x32xf32>
    %22 = vector.extract_strided_slice %21 {offsets = [0, 0], sizes = [1, 32], strides = [1, 1]} : vector<2x32xf32> to vector<1x32xf32>
    %23 = vector.broadcast %22 : vector<1x32xf32> to vector<8x32xf32>
    %24 = arith.mulf %20, %23 : vector<8x32xf32>
    %25 = vector.extract_strided_slice %21 {offsets = [1, 0], sizes = [1, 32], strides = [1, 1]} : vector<2x32xf32> to vector<1x32xf32>
    %26 = vector.broadcast %25 : vector<1x32xf32> to vector<8x32xf32>
    %27 = arith.addf %24, %26 : vector<8x32xf32>
    %28 = arith.truncf %27 : vector<8x32xf32> to vector<8x32xbf16>
    %c0_8 = arith.constant 0 : index
    %c0_9 = arith.constant 0 : index
    %29 = vector.load %arg3[%c0_8, %c0_9] : memref<32x32xbf16, #tpu.memory_space<vmem>>, vector<32x32xbf16>
    %cst_10 = arith.constant dense<0.000000e+00> : vector<8x32xf32>
    %30 = tpu.matmul %28, %29, %cst_10 {dimension_numbers = #tpu.dot_dimension_numbers<[1], [0], [0], [1], [0, 0, 1, 1], [], []>} : vector<8x32xbf16>, vector<32x32xbf16>, vector<8x32xf32> -> vector<8x32xf32>
    %c0_11 = arith.constant 0 : index
    %c0_12 = arith.constant 0 : index
    %31 = vector.load %arg4[%c0_11, %c0_12] : memref<1x32xf32, #tpu.memory_space<vmem>>, vector<1x32xf32>
    %32 = vector.broadcast %31 : vector<1x32xf32> to vector<8x32xf32>
    %33 = arith.addf %30, %32 : vector<8x32xf32>
    %c0_13 = arith.constant 0 : index
    %c0_14 = arith.constant 0 : index
    %34 = vector.load %arg5[%c0_13, %c0_14] : memref<8x32xf32, #tpu.memory_space<vmem>>, vector<8x32xf32>
    tpu.vector_store %arg5[%c0_13, %c0_14], %33 {strides = array<i32>} : memref<8x32xf32, #tpu.memory_space<vmem>>, vector<8x32xf32>,
    return
  }
  func.func @transform_0(%arg0: i32) -> (i32, i32) {
    %c0_i32 = arith.constant 0 : i32
    %c0_i32_0 = arith.constant 0 : i32
    return %arg0, %c0_i32 : i32, i32
  }
  func.func @transform_1(%arg0: i32) -> (i32, i32) {
    %c0_i32 = arith.constant 0 : i32
    %c0_i32_0 = arith.constant 0 : i32
    %c0_i32_1 = arith.constant 0 : i32
    return %c0_i32, %c0_i32_0 : i32, i32
  }
  func.func @transform_2(%arg0: i32) -> (i32, i32) {
    %c0_i32 = arith.constant 0 : i32
    %c0_i32_0 = arith.constant 0 : i32
    %c0_i32_1 = arith.constant 0 : i32
    return %c0_i32, %c0_i32_0 : i32, i32
  }
  func.func @transform_3(%arg0: i32) -> (i32, i32) {
    %c0_i32 = arith.constant 0 : i32
    %c0_i32_0 = arith.constant 0 : i32
    %c0_i32_1 = arith.constant 0 : i32
    return %c0_i32, %c0_i32_0 : i32, i32
  }
  func.func @transform_4(%arg0: i32) -> (i32, i32) {
    %c0_i32 = arith.constant 0 : i32
    %c0_i32_0 = arith.constant 0 : i32
    return %arg0, %c0_i32 : i32, i32
  }
}

</mosaic_0001>

<bundles_post_ra>
// kernel: tpu_custom_call.1
= control target key start
LH: loop header
LB: loop body
LE: loop exit
PB: predicated region body
PF: predicated region fallthrough
CT: control target
= control target key end

     0   :  { %9 = vsyncpa [#allocation3], 0  ;;  %s918_s0 = inlined_call_operand.hbm [shape: f32[16,32], index: 0, kind: input, shape index: {}]   ;;  %s919_s1 = inlined_call_operand.hbm [shape: f32[2,32], index: 1, kind: input, shape index: {}]   ;;  %s920_s2 = inlined_call_operand.hbm [shape: bf16[32,32], index: 2, kind: input, shape index: {}]   ;;  %s921_s3 = inlined_call_operand.vmem [shape: f32[1,32], index: 3, kind: input, shape index: {}]   ;;  %s922_s4 = inlined_call_operand.hbm [shape: f32[16,32], index: 4, kind: output, shape index: {}]  }
   0x1   :  { %11 = vsyncpa [#allocation3 + $0x1], 0 }
   0x2   :  { %12 = vsyncpa [#allocation6], 0 }
   0x3   :  { %13 = vsyncpa [#allocation4], 0 }
   0x4   :  { %15 = vsyncpa [#allocation4 + $0x1], 0  ;;  %s730_s15 = smov 0   ;;  %s732_s16 = smov 0  }
   0x5   :  { %s734_s17 = smov 0   ;;  %s736_s18 = smov 0  }
   0x6 LB: > { %s751_s19 = sadd.s32 4294967295, %s695_s18   ;;  %s441_s20 = sadd.s32 4294967294, %s695_s18   ;;  %s695_s18 = sphi %s736_s18, %s944_s18   ;;  %s691_s17 = sphi %s734_s17, %s943_s17   ;;  %s687_s16 = sphi %s732_s16, %s942_s16   ;;  %s683_s15 = sphi %s730_s15, %s941_s15  }
   0x7   : > { %p41_p0 = scmp.ne.s32.totalorder %s687_s16, %s683_s15  ;;  %p923_p1 = scmp.eq.s32.totalorder %s751_s19, 0 }
   0x8   : > { %p134_p3 = scmp.eq.s32.totalorder %s441_s20, 1  ;;  %p442_p5 = scmp.ge.s32.totalorder %s695_s18, 1 }
   0x9   : > { %p760_p4 = por %p923_p1, %p41_p0  ;;  %p141_p7 = scmp.lt.s32.totalorder %s695_s18, 3 }
   0xa   : > { %p765_p6 = por %p134_p3, %p41_p0  ;;  %s697_s24 = smov [#allocation5]  }
   0xb   : > { %s927_s21 = scalar_select %p760_p4, 1, 0 }
   0xc   : > { %s928_s22 = scalar_select %p765_p6, 1, 0 }
   0xd   : > { %p770_p8 = pnand %p442_p5, %p141_p7  ;;  %s154_s25 = sshll.u32 %s697_s24, 4  ;;  %s155_s25 = int_to_ptr.vmem [resolvable:$true] %s154_s25 }
   0xe   : > { %s698_s26 = smov [#allocation7]   ;;  %s558_s29 = scalar_lea.vmem %s155_s25, 32 }
   0xf   : > { %s929_s23 = scalar_select %p770_p8, 1, 0 }
  0x10   : > { %p484_p10 = pneg %p770_p8  ;;  %s164_s27 = sshll.u32 %s698_s26, 4  ;;  %s165_s27 = int_to_ptr.vmem [resolvable:$true] %s164_s27 }
  0x11   : > { %p559_p13 = scmp.ne.s32.totalorder %s155_s25, %s558_s29  ;;  %p566_p5 = scmp.lt.s32.totalorder %s155_s25, %s155_s25 }
  0x12   : > { %p779_p11 = pnand %p484_p10, %p923_p1  ;;  %p567_p7 = scmp.lt.s32.totalorder %s558_s29, %s558_s29 }
  0x14   : > { %p549_p12 = pneg %p779_p11  ;;  %p568_p9 = por %p567_p7, %p566_p5 }
  0x16   : > { %p561_p0 = pnand %p559_p13, %p549_p12 }
  0x18   : > { %p562_p3 = pneg %p561_p0 }
  0x1a   : > { %p569_p2 = pnand %p568_p9, %p562_p3 }
  0x1c   : > { %572 = shalt.err (!%p569_p2)
}
  0x1d   : > { %487 = dma.hbm_to_vmem [thread:$0]  (!%p779_p11), %s919_s1, 32, %s155_s25, [#allocation6]  }
  0x1e   : > { %s584_s6 = scalar_lea.vmem %s165_s27, 256  ;;  %p592_p13 = scmp.lt.s32.totalorder %s165_s27, %s165_s27 }
  0x1f   : > { %p585_p10 = scmp.ne.s32.totalorder %s165_s27, %s584_s6  ;;  %p593_p0 = scmp.lt.s32.totalorder %s584_s6, %s584_s6 }
  0x21   : > { %p587_p1 = pnand %p585_p10, %p549_p12  ;;  %p594_p4 = por %p593_p0, %p592_p13 }
  0x23   : > { %p588_p6 = pneg %p587_p1 }
  0x25   : > { %p595_p8 = pnand %p594_p4, %p588_p6 }
  0x27   : > { %598 = shalt.err (!%p595_p8)
}
  0x28   : > { %s699_s7 = smov 64   ;;  %s700_s8 = smov 4  }
  0x29   : > { %490 = dma.hbm_to_vmem [thread:$0]  (!%p779_p11), %s920_s2, 256, %s165_s27, [#allocation6], %s699_s7, %s699_s7, %s700_s8  }
  0x2a   : > { %s802_s11 = sadd.s32 1, %s695_s18   ;;  %s28_s12 = sadd.s32 1, %s691_s17 }
  0x2b   : > { %s25_s13 = ssub.s32 %s695_s18, %s802_s11  ;;  %p35_p1 = scmp.ne.s32.totalorder %s691_s17, %s687_s16 }
  0x2c   : > { %p26_p2 = scmp.eq.s32.totalorder %s25_s13, 0  ;;  %p36_p4 = scmp.eq.s32.totalorder %s695_s18, 0 }
  0x2d   : > { %p931_p6 = scmp.eq.s32.totalorder %s751_s19, 1  ;;  %p501_p9 = scmp.lt.s32.totalorder %s695_s18, 2 }
  0x2e   : > { %s818_s20 = scalar_select %p26_p2, %s691_s17, %s28_s12  }
  0x2f   : > { %p812_p8 = por %p931_p6, %p35_p1  ;;  %p37_p12 = por %p36_p4, %p35_p1 }
  0x30   : > { %s181_s24 = sand.u32 1, %s691_s17   ;;  %s447_s26 = sshll.u32 %s695_s18, 7 }
  0x31   : > { %s932_s14 = scalar_select %p812_p8, 1, 0 }
  0x32   : > { %s446_s25 = sshll.u32 %s181_s24, 3  ;;  %s825_s29 = scalar_lea.hbm %s918_s0, %s447_s26 }
  0x33   : > { %s185_s30 = scalar_lea.vmem [#allocation2], %s446_s25  ;;  %p827_p11 = pnand %p501_p9, %p37_p12 }
  0x34   : > { %s192_s5 = sshll.u32 %s185_s30, 4  ;;  %s182_s7 = scalar_lea.sflag [#allocation3], %s181_s24  ;;  %s193_s5 = int_to_ptr.vmem [resolvable:$true] %s192_s5 }
  0x35   : > { %s599_s8 = scalar_lea.hbm %s825_s29, 128  ;;  %p601_p5 = pneg %p827_p11 }
  0x36   : > { %p600_p3 = scmp.ne.s32.totalorder %s825_s29, %s599_s8  ;;  %s604_s12 = scalar_lea.hbm %s918_s0, 256 }
  0x37   : > { %p605_p13 = scmp.lt.s32.totalorder %s825_s29, %s918_s0  ;;  %p606_p0 = scmp.lt.s32.totalorder %s604_s12, %s599_s8 }
  0x38   : > { %p602_p7 = pnand %p601_p5, %p600_p3 }
  0x39   : > { %p607_p1 = por %p606_p0, %p605_p13 }
  0x3a   : > { %p603_p10 = pneg %p602_p7 }
  0x3c   : > { %p608_p2 = pnand %p607_p1, %p603_p10 }
  0x3e   : > { %611 = shalt.err (!%p608_p2)
}
  0x3f   : > { %s612_s26 = scalar_lea.vmem %s193_s5, 128  ;;  %s701_s24 = smov [#allocation2]  }
  0x40   : > { %p613_p4 = scmp.ne.s32.totalorder %s193_s5, %s612_s26  ;;  %s617_s27 = sshll.u32 %s701_s24, 4  ;;  %s618_s27 = int_to_ptr.vmem [resolvable:$false] %s617_s27 }
  0x41   : > { %s619_s28 = scalar_lea.vmem %s618_s27, 256  ;;  %p620_p12 = scmp.lt.s32.totalorder %s193_s5, %s618_s27 }
  0x42   : > { %p615_p6 = pnand %p613_p4, %p601_p5  ;;  %p621_p3 = scmp.lt.s32.totalorder %s619_s28, %s612_s26 }
  0x44   : > { %p616_p9 = pneg %p615_p6  ;;  %p622_p7 = por %p621_p3, %p620_p12 }
  0x46   : > { %p623_p8 = pnand %p622_p7, %p616_p9 }
  0x48   : > { %626 = shalt.err (!%p623_p8)
}
  0x49   : > { %494 = dma.hbm_to_vmem [thread:$0]  (!%p827_p11), %s825_s29, 128, %s193_s5, %s182_s7  }
  0x4a   : > { %p934_p10 = scmp.ne.s32.totalorder %s929_s23, 0 }
  0x4b   : > { %s848_s30 = sand.u32 (!%p934_p10), 1, %s687_s16   ;;  %p935_p5 = scmp.ne.s32.totalorder (!%p934_p10), %s927_s21, 0 }
  0x4c   : > { %201 = sbr.rel (%p934_p10) target bundleno = 468 (0x1d4), region = 36  ;;  %s449_s8 = sshll.u32 (!%p934_p10), %s848_s30, 3 }
  0x4d   : > { %s204_s9 = scalar_lea.sflag (!%p934_p10), [#allocation3], %s848_s30  ;;  %s207_s10 = scalar_lea.vmem (!%p934_p10), [#allocation2], %s449_s8 }
  0x51   : > { %670 = dma.done.wait (%p935_p5), %s204_s9, 128  }
  0x52   : > { %672 = vsyncadd (%p935_p5), %s204_s9, 4294967168  ;;  %p936_p8 = scmp.eq.s32.totalorder %s751_s19, 0 }
  0x54   : > { %674 = dma.done.wait (%p936_p8), [#allocation6], 288   ;;  %p937_p11 = pmov %p936_p8 }
  0x55   : > { %vm242_vm0 = vcmask 261120   ;;  %v241_v0 = vld [vmem:[%s207_s10] sm:$0xff]  ;;  %v702_v5 = vmov 0.0   ;;  %vm703_vm1 = vmmov 0   ;;  %v544_v6 = vld [vmem:[#allocation7] sm:$0xff]   ;;  %v260_v15 = vlaneseq  ;;  %s458_s29 = sshll.u32 %s751_s19, 7 }
  0x56   : > { %676 = vsyncadd (%p937_p11), [#allocation6], 4294967008  ;;  %v243_v1 = vsel %vm242_vm0, %v241_v0, 0.0  ;;  %v247_v2 = vmul.f32 %v241_v0, %v241_v0  ;;  %v543_v4 = vld [vmem:[#allocation7 + $0x8] sm:$0xff]   ;;  %464 = vmatprep.subr.bf16.mxu0 %v702_v5  ;;  %468 = vmatprep.mubr.msk.bf16.mxu0 %vm703_vm1, %v702_v5  ;;  %v259_v18 = vld [vmem:[#allocation5] sm:$0x3]  ;;  %s874_s13 = scalar_lea.hbm %s922_s4, %s458_s29 }
  0x57   : > { %244 = vadd.xlane.f32.xlu0 %v243_v1  ;;  %465 = vmatpush3.bf16.msra.mxu0 %v543_v4  ;;  %v261_v16 = vshrl.u32 %v260_v15, 7  ;;  %v453_v28 = vld [vmem:[%s921_s3] ss:$0 sm:$0xff]  ;;  %s239_s5 = scalar_lea.vmem [#allocation8], %s449_s8  ;;  %s339_s19 = scalar_lea.sflag [#allocation4], %s848_s30 }
  0x58   : > { %v248_v3 = vsel %vm242_vm0, %v247_v2, 0.0  ;;  %466 = vmatprep.subr.bf16.mxu0 %v702_v5  ;;  %s352_s6 = sshll.u32 %s239_s5, 4  ;;  %p938_p0 = scmp.ne.s32.totalorder %s932_s14, 0  ;;  %s876_s6 = int_to_ptr.vmem [resolvable:$true] %s352_s6 }
  0x59   : > { %v262_v17 = vsub.s32 0, %v261_v16  ;;  %v267_v19 = vsub.s32 1, %v261_v16  ;;  %s627_s25 = scalar_lea.vmem %s876_s6, 128  ;;  %s704_s26 = smov [#allocation8]  }
  0x5a   : > { %p628_p13 = scmp.ne.s32.totalorder %s876_s6, %s627_s25  ;;  %s631_s24 = sshll.u32 %s704_s26, 4  ;;  %s632_s24 = int_to_ptr.vmem [resolvable:$false] %s631_s24 }
  0x5b   : > { %249 = vadd.xlane.f32.xlu0 %v248_v3  ;;  %467 = vmatpush3.bf16.msra.mxu0 %v544_v6  ;;  %v263_v21 = vrot.slane %v259_v18, %v262_v17  ;;  %v268_v24 = vrot.slane %v259_v18, %v267_v19  ;;  %s633_s27 = scalar_lea.vmem %s632_s24, 256  ;;  %p634_p4 = scmp.lt.s32.totalorder %s876_s6, %s632_s24 }
  0x5c   : > { %p629_p1 = pnand %p628_p13, %p938_p0  ;;  %p635_p6 = scmp.lt.s32.totalorder %s633_s27, %s627_s25 }
  0x5e   : > { %p630_p2 = pneg %p629_p1  ;;  %p636_p9 = por %p635_p6, %p634_p4 }
  0x60   : > { %p637_p12 = pnand %p636_p9, %p630_p2 }
  0xe0   : > { %v245_v7 = vpop.xlane.xlu0 %244 }
  0xe1   : > { %v246_v8 = vmul.f32 0.03125, %v245_v7 }
  0xe3   : > { %v252_v10 = vmul.f32 %v246_v8, %v246_v8  ;;  %v255_v20 = vsub.f32 %v241_v0, %v246_v8 }
  0xe4   : > { %v250_v9 = vpop.xlane.xlu0 %249 }
  0xe5   : > { %v251_v11 = vmul.f32 0.03125, %v250_v9 }
  0xe7   : > { %v253_v12 = vsub.f32 %v251_v11, %v252_v10 }
  0xe9   : > { %v254_v13 = vmax.f32 %v253_v12, 0.0 }
  0xeb   : > { %v256_v14 = vadd.f32 1e-05, %v254_v13 }
  0xed   : > { %545 = vrsqrt.f32 %v256_v14 }
  0xfa   : > { %v546_v22 = vpop.eup %545 }
  0xfb   : > { %v258_v23 = vmul.f32 %v546_v22, %v255_v20 }
  0xfd   : > { %v264_v25 = vmul.f32 %v263_v21, %v258_v23 }
  0xff   : > { %v269_v26 = vadd.f32 %v268_v24, %v264_v25 }
 0x101   : > { %v270_v27 = vpack.c.bf16 %v269_v26, %v269_v26 }
 0x103   : > { %469 = vmatmul.mubr.msk.bf16.vlgmr.msra.gmra.mxu0 %vm242_vm0, %v270_v27 }
 0x1c3   : > { %v331_v29 = vpop.f32.mrf.mxu0 }
 0x1c4   : > { %v332_v30 = vadd.f32 %v453_v28, %v331_v29 }
 0x1c5   : > { %v470_v31 = vpop.f32.mrf.mxu0 }
 0x1c6   : > { %337 = vst.msk [vmem:[%s239_s5] sm:$0xff] %vm242_vm0, %v332_v30 }
 0x1c7   : > { %v334_v32 = vpop.f32.mrf.mxu0 }
 0x1c8   : > { %640 = shalt.err (!%p637_p12)
}
 0x1c9   : > { %s641_s28 = scalar_lea.hbm %s874_s13, 128  ;;  %s645_s9 = scalar_lea.hbm %s922_s4, 256 }
 0x1ca   : > { %p642_p3 = scmp.ne.s32.totalorder %s874_s13, %s641_s28  ;;  %p646_p5 = scmp.lt.s32.totalorder %s874_s13, %s922_s4 }
 0x1cb   : > { %p647_p8 = scmp.lt.s32.totalorder %s645_s9, %s641_s28 }
 0x1cc   : > { %p643_p7 = pnand %p642_p3, %p938_p0 }
 0x1cd   : > { %p648_p11 = por %p647_p8, %p646_p5 }
 0x1ce   : > { %p644_p10 = pneg %p643_p7 }
 0x1d0   : > { %p649_p13 = pnand %p648_p11, %p644_p10 }
 0x1d2   : > { %652 = shalt.err (!%p649_p13)
}
 0x1d3   : > { %482 = dma.vmem_to_hbm [thread:$0]  (%p938_p0), %s876_s6, 128, %s874_s13, %s339_s19   ;;  %v471_v33 = vpop.f32.mrf.mxu0 }
 0x1d4 PF: > { %s364_s23 = sand.u32 1, %s683_s15   ;;  %p939_p1 = scmp.ne.s32.totalorder %s928_s22, 0 }
 0x1d5   : > { %p940_p2 = scmp.ge.s32.totalorder %s695_s18, 2  ;;  %s365_s29 = scalar_lea.sflag [#allocation4], %s364_s23 }
 0x1d7   : > { %p496_p4 = pnand %p940_p2, %p939_p1 }
 0x1d9   : > { %p497_p6 = pneg %p496_p4 }
 0x1db   : > { %678 = dma.done.wait (%p497_p6), %s365_s29, 128  }
 0x1dc   : > { %680 = vsyncadd (%p497_p6), %s365_s29, 4294967168  ;;  %p18_p9 = scmp.ge.s32.totalorder %s802_s11, 4   ;;  %s941_s15 = smov %s687_s16 }
 0x1dd   : > { %s942_s16 = smov %s691_s17  ;;  %s943_s17 = smov %s818_s20 }
 0x1de   : > { %s944_s18 = smov %s802_s11  ;;  %20 = sbr.rel (!%p18_p9) target bundleno = 6 (0x6), region = 89 }
 0x1e3   :  { %370 = vsyncpa [#allocation3], 1 }
 0x1e4   :  { %372 = vsyncpa [#allocation3 + $0x1], 1 }
 0x1e5   :  { %373 = vsyncpa [#allocation6], 1 }
 0x1e6   :  { %374 = vsyncpa [#allocation4], 1 }
 0x1e7   :  { %376 = vsyncpa [#allocation4 + $0x1], 1 }

</bundles_post_ra>
